<compile_context>
chip_gen: v7x
topology: tpu7x:2x2x1
jax: 0.10.0
libtpu: 0.0.40
codegen_flags: <defaults>
</compile_context>

<pallas_src>
import math
from functools import partial

import jax
import jax.numpy as jnp
from jax import lax
from jax.experimental import pallas as pl
from jax.experimental.pallas import tpu as pltpu

_EPS = 1e-5
_INV_SQRT2 = 1.0 / math.sqrt(2.0)
_TANH_C = math.sqrt(2.0 / math.pi)


def _round_up(x, m):
    return ((x + m - 1) // m) * m


def _gelu(x, approx):
    if approx:
        # tanh approximation: jnp.tanh uses the EUP (separate bundle slot),
        # relieving the VALU.  Deviates slightly from torch.nn.GELU() default.
        return 0.5 * x * (1.0 + jnp.tanh(_TANH_C * (x + 0.044715 * x * x * x)))
    return 0.5 * x * (1.0 + lax.erf(x * _INV_SQRT2))  # exact erf (torch default)


def _tile_stats(h, *, block_rows, batch):
    """Per-tile BatchNorm partials: (row-sum, centered sum-of-squares).

    Centered per-tile M2 + Chan's combine in the wrapper avoids the
    E[x^2]-E[x]^2 cancellation of the previous version.  Padded rows are
    masked out (only compiled in when the batch was actually padded).
    """
    if batch % block_rows == 0:                        # static: no padded rows
        s = jnp.sum(h, axis=0, keepdims=True)          # (1, H)
        d = h - s * (1.0 / block_rows)
        m2 = jnp.sum(d * d, axis=0, keepdims=True)     # (1, H)
    else:
        rows = (pl.program_id(0) * block_rows
                + lax.broadcasted_iota(jnp.int32, (block_rows, 1), 0))
        mask = (rows < batch).astype(h.dtype)          # (tb, 1)
        hm = h * mask
        s = jnp.sum(hm, axis=0, keepdims=True)         # (1, H)
        cnt = jnp.sum(mask, axis=0, keepdims=True)     # (1, 1) valid-row count
        d = (h - s / cnt) * mask
        m2 = jnp.sum(d * d, axis=0, keepdims=True)
    return s, m2


def _store_partials(p_ref, s, m2):
    # Two direct sub-row stores into the (1, 2, H) block — no in-kernel concat.
    p_ref[0, 0:1, :] = s
    p_ref[0, 1:2, :] = m2


# ---------------------------------------------------------------------------
# Pass 1: h1 = [x|se|ae] @ W1 (single fused dot); cache h1, emit BN1 partials.
def _stats1_kernel(x_ref, w1_ref, h1_ref, p_ref, *, block_rows, batch):
    h1 = jnp.dot(x_ref[...], w1_ref[...], preferred_element_type=jnp.float32)
    h1_ref[...] = h1
    s, m2 = _tile_stats(h1, block_rows=block_rows, batch=batch)
    _store_partials(p_ref, s, m2)


# ---------------------------------------------------------------------------
# Pass 2: h2 = gelu(bn1(h1)) @ W2 from cached h1; cache h2, emit BN2 partials.
def _stats2_kernel(h1_ref, v_ref, w2_ref, h2_ref, p_ref, *,
                   block_rows, batch, approx):
    z1 = _gelu(h1_ref[...] * v_ref[0:1, :] + v_ref[1:2, :], approx)
    h2 = jnp.dot(z1.astype(jnp.bfloat16), w2_ref[...],
                 preferred_element_type=jnp.float32)
    h2_ref[...] = h2
    s, m2 = _tile_stats(h2, block_rows=block_rows, batch=batch)
    _store_partials(p_ref, s, m2)


# ---------------------------------------------------------------------------
# Pass 3: out = gelu(gelu(bn2(h2)) @ W3 + b3) @ W4 + b4  (no layer-1/2 redo).
def _forward_kernel(h2_ref, v_ref, w3_ref, w4_ref, b4_ref, out_ref, *, approx):
    z2 = _gelu(h2_ref[...] * v_ref[0:1, :] + v_ref[1:2, :], approx)
    h3 = jnp.dot(z2.astype(jnp.bfloat16), w3_ref[...],
                 preferred_element_type=jnp.float32) + v_ref[2:3, :]
    z3 = _gelu(h3, approx)
    out_ref[...] = (jnp.dot(z3.astype(jnp.bfloat16), w4_ref[...],
                            preferred_element_type=jnp.float32) + b4_ref[...])


def _bn_scale_shift(partials, counts, batch, gamma, beta):
    """Chan's parallel-variance combine of per-tile (sum, centered-M2) partials
    -> fused training-mode BatchNorm scale/shift (f32, biased variance)."""
    s_t, m2_t = partials[:, 0, :], partials[:, 1, :]            # (T, H)
    mean = jnp.sum(s_t, axis=0, keepdims=True) / batch          # (1, H)
    mu_t = s_t / counts[:, None]
    m2 = (jnp.sum(m2_t, axis=0, keepdims=True)
          + jnp.sum(counts[:, None] * (mu_t - mean) ** 2, axis=0, keepdims=True))
    var = m2 / batch
    inv = lax.rsqrt(var + _EPS)
    scale = (gamma * inv).astype(jnp.float32)
    shift = (beta - mean * gamma * inv).astype(jnp.float32)
    return scale, shift


def _vmem_limit_bytes():
    try:
        kind = jax.devices()[0].device_kind.lower()
    except Exception:
        return None
    if "v5" in kind or "v6" in kind:
        return 96 * 1024 * 1024     # 128 MiB physical: spend it on bigger tiles
    if "v7" in kind or "7x" in kind:
        return 48 * 1024 * 1024     # 64 MiB physical: leave headroom
    return None                     # unknown generation: compiler default


def init_params(key, input_dim, output_dim, hidden_dim, encoding_dim,
                num_states, num_actions):
    keys = jax.random.split(key, 6)
    d_in = input_dim + 2 * encoding_dim

    def linear(k, fan_in, fan_out):
        bound = 1.0 / math.sqrt(fan_in)
        kw, kb = jax.random.split(k)
        w = jax.random.uniform(kw, (fan_in, fan_out), jnp.float32, -bound, bound)
        b = jax.random.uniform(kb, (1, fan_out), jnp.float32, -bound, bound)
        return w, b

    # b1/b2 omitted: a bias added immediately before training-mode BatchNorm is
    # cancelled exactly by the mean subtraction (the forward is unchanged).
    # Running-stats / eval mode would need them back.
    w1, _ = linear(keys[0], d_in, hidden_dim)
    w2, _ = linear(keys[1], hidden_dim, hidden_dim)
    w3, b3 = linear(keys[2], hidden_dim, hidden_dim)
    w4, b4 = linear(keys[3], hidden_dim, output_dim)

    return dict(
        w1=w1,
        g1=jnp.ones((1, hidden_dim), jnp.float32),
        be1=jnp.zeros((1, hidden_dim), jnp.float32),
        w2=w2,
        g2=jnp.ones((1, hidden_dim), jnp.float32),
        be2=jnp.zeros((1, hidden_dim), jnp.float32),
        w3=w3, b3=b3,
        w4=w4, b4=b4,
        state_table=jax.random.normal(keys[4], (num_states, encoding_dim), jnp.float32),
        action_table=jax.random.normal(keys[5], (num_actions, encoding_dim), jnp.float32),
    )


def ednet_mlp_forward(inputs, state, action, params, *, block_rows=4096,
                      approx_gelu=False):
    # Embedding gathers in plain-JAX glue (tiny); everything else in Pallas.
    s_emb = params["state_table"][state]
    a_emb = params["action_table"][action]

    batch = inputs.shape[0]
    hidden = params["w2"].shape[0]
    out_dim = params["w4"].shape[1]

    # Single fused first-layer operand; XLA fuses the concat+pad+cast.
    xcat = jnp.concatenate(
        [inputs.astype(jnp.float32), s_emb.astype(jnp.float32),
         a_emb.astype(jnp.float32)], axis=1)
    d_in = xcat.shape[1]
    d_in_pad = _round_up(d_in, 16)          # bf16 sublane packing of W1's K dim

    # Row tile: big (per-grid-step overhead dominates small tiles) but capped at
    # ceil(batch/2) so the "parallel" axis keeps >= 2 tiles for both v7x TCs.
    tb = min(_round_up(block_rows, 8), _round_up(pl.cdiv(batch, 2), 8))
    tb = max(tb, 8)
    b_pad = _round_up(batch, tb)
    n_tiles = b_pad // tb

    xcat = jnp.pad(xcat, ((0, b_pad - batch), (0, d_in_pad - d_in))).astype(jnp.bfloat16)

    # Weights: bf16 matmul operands (f32 MXU accumulation); BN/GELU math is f32.
    w1 = jnp.pad(params["w1"], ((0, d_in_pad - d_in), (0, 0))).astype(jnp.bfloat16)
    w2 = params["w2"].astype(jnp.bfloat16)
    w3 = params["w3"].astype(jnp.bfloat16)
    b3 = params["b3"].astype(jnp.float32)

    # Lane-dense final store: pad output columns to a multiple of 128.
    # TODO(synk): for very small out_dim at huge batch, a bf16 or row-packed
    # output slab would cut the f32 write amplification (matters most on v5e).
    out_pad = _round_up(out_dim, 128)
    w4 = jnp.pad(params["w4"], ((0, 0), (0, out_pad - out_dim))).astype(jnp.bfloat16)
    b4 = jnp.pad(params["b4"], ((0, 0), (0, out_pad - out_dim))).astype(jnp.float32)

    def row_spec(d):
        return pl.BlockSpec((tb, d), lambda t: (t, 0))

    def resident(a):
        # Constant index_map: fetched once, VMEM-resident across batch tiles.
        # TODO(synk): at large hidden on v7x, mark these pipeline_mode=
        # pl.Buffered(1) so never-changing weights are not double-buffered.
        return pl.BlockSpec(a.shape, lambda t: (0, 0))

    part_spec = pl.BlockSpec((1, 2, hidden), lambda t: (t, 0, 0))
    part_shape = jax.ShapeDtypeStruct((n_tiles, 2, hidden), jnp.float32)
    cache_shape = jax.ShapeDtypeStruct((b_pad, hidden), jnp.float32)
    cparams = pltpu.CompilerParams(
        dimension_semantics=("parallel",),        # batch tiles -> both TCs on v7x
        vmem_limit_bytes=_vmem_limit_bytes())

    counts = jnp.asarray([min(tb, batch - t * tb) for t in range(n_tiles)],
                         jnp.float32)

    # ---- pass 1: h1 cache + BN1 partials -------------------------------------
    h1c, p1 = pl.pallas_call(
        partial(_stats1_kernel, block_rows=tb, batch=batch),
        out_shape=(cache_shape, part_shape),
        grid=(n_tiles,),
        in_specs=[row_spec(d_in_pad), resident(w1)],
        out_specs=(row_spec(hidden), part_spec),
        compiler_params=cparams,
    )(xcat, w1)
    sc1, sh1 = _bn_scale_shift(p1, counts, batch, params["g1"], params["be1"])
    vec1 = jnp.concatenate([sc1, sh1], axis=0)               # (2, H) resident

    # ---- pass 2: h2 cache + BN2 partials (reads cached h1, no recompute) ------
    h2c, p2 = pl.pallas_call(
        partial(_stats2_kernel, block_rows=tb, batch=batch, approx=approx_gelu),
        out_shape=(cache_shape, part_shape),
        grid=(n_tiles,),
        in_specs=[row_spec(hidden), resident(vec1), resident(w2)],
        out_specs=(row_spec(hidden), part_spec),
        compiler_params=cparams,
    )(h1c, vec1, w2)
    sc2, sh2 = _bn_scale_shift(p2, counts, batch, params["g2"], params["be2"])
    vec3 = jnp.concatenate([sc2, sh2, b3], axis=0)            # (3, H) resident

    # ---- pass 3: layers 3-4 from cached h2, lane-dense [tb, out_pad] stores ---
    out = pl.pallas_call(
        partial(_forward_kernel, approx=approx_gelu),
        out_shape=jax.ShapeDtypeStruct((b_pad, out_pad), jnp.float32),
        grid=(n_tiles,),
        in_specs=[row_spec(hidden), resident(vec3), resident(w3),
                  resident(w4), resident(b4)],
        out_specs=pl.BlockSpec((tb, out_pad), lambda t: (t, 0)),
        compiler_params=cparams,
    )(h2c, vec3, w3, w4, b4)

    return out[:batch, :out_dim]


def ednet_mlp_reference(inputs, state, action, params):
    """Pure-JAX reference: bf16 matmul operands, f32 math, centered training-mode
    BatchNorm, exact erf GELU — mirrors the torch module's forward."""
    s_emb = params["state_table"][state]
    a_emb = params["action_table"][action]
    x = jnp.concatenate([inputs, s_emb, a_emb], axis=1).astype(jnp.bfloat16)

    def bn(h, gamma, beta):
        m = jnp.mean(h, axis=0, keepdims=True)
        v = jnp.mean((h - m) ** 2, axis=0, keepdims=True)   # biased (training mode)
        return (h - m) * (gamma * lax.rsqrt(v + _EPS)) + beta

    h = jnp.dot(x, params["w1"].astype(jnp.bfloat16), preferred_element_type=jnp.float32)
    h = _gelu(bn(h, params["g1"], params["be1"]), False)
    h = jnp.dot(h.astype(jnp.bfloat16), params["w2"].astype(jnp.bfloat16),
                preferred_element_type=jnp.float32)
    h = _gelu(bn(h, params["g2"], params["be2"]), False)
    h = jnp.dot(h.astype(jnp.bfloat16), params["w3"].astype(jnp.bfloat16),
                preferred_element_type=jnp.float32) + params["b3"]
    h = _gelu(h, False)
    return jnp.dot(h.astype(jnp.bfloat16), params["w4"].astype(jnp.bfloat16),
                   preferred_element_type=jnp.float32) + params["b4"]


if __name__ == "__main__":
    # batch=30 with the ceil(batch/2) tile cap gives tb=16, n_tiles=2, 2 padded
    # rows: exercises multi-tile Chan variance combine, padded-row masking, and
    # the h1/h2 cross-pass caches.
    B = 30
    input_dim = 16
    output_dim = 4
    hidden_dim = 32
    encoding_dim = 16
    num_states = 480 + 1
    num_actions = 3

    key = jax.random.PRNGKey(0)
    k_in, k_st, k_ac, k_p = jax.random.split(key, 4)

    inputs = jax.random.normal(k_in, (B, input_dim), jnp.float32)
    state = jax.random.randint(k_st, (B,), 0, num_states)
    action = jax.random.randint(k_ac, (B,), 0, num_actions)

    params = init_params(k_p, input_dim, output_dim, hidden_dim, encoding_dim,
                         num_states, num_actions)

    logits = ednet_mlp_forward(inputs, state, action, params)
    jax.block_until_ready(logits)
    assert logits.shape == (B, output_dim)

    ref = ednet_mlp_reference(inputs, state, action, params)
    max_err = float(jnp.max(jnp.abs(logits - ref)))
    assert jnp.allclose(logits, ref, atol=1e-2, rtol=1e-2), max_err

    print("KERNEL_OK")
</pallas_src>

<mosaic_0001>
module attributes {stable_mosaic.version = 11 : i64} {
  func.func @_stats1_kernel(%arg0: i32, %arg1: memref<16x48xbf16, #tpu.memory_space<vmem>>, %arg2: memref<48x32xbf16, #tpu.memory_space<vmem>>, %arg3: memref<16x32xf32, #tpu.memory_space<vmem>>, %arg4: memref<1x2x32xf32, #tpu.memory_space<vmem>>) attributes {dimension_semantics = [#tpu.dimension_semantics<parallel>], iteration_bounds = array<i64: 2>, scalar_prefetch = 0 : i64, scratch_operands = 0 : i64, tpu.core_type = #tpu.core_type<tc>, window_params = [{transform_indices = @transform_0, window_bounds = array<i64: 16, 48>}, {pipeline_mode = #tpu.pipeline_mode<synchronous>, transform_indices = @transform_1, window_bounds = array<i64: 48, 32>}, {transform_indices = @transform_2, window_bounds = array<i64: 16, 32>}, {transform_indices = @transform_3, window_bounds = array<i64: 1, 2, 32>}]} {
    %c0 = arith.constant 0 : index
    %c0_0 = arith.constant 0 : index
    %0 = vector.load %arg1[%c0, %c0_0] : memref<16x48xbf16, #tpu.memory_space<vmem>>, vector<16x48xbf16>
    %c0_1 = arith.constant 0 : index
    %c0_2 = arith.constant 0 : index
    %1 = vector.load %arg2[%c0_1, %c0_2] : memref<48x32xbf16, #tpu.memory_space<vmem>>, vector<48x32xbf16>
    %cst = arith.constant dense<0.000000e+00> : vector<16x32xf32>
    %2 = tpu.matmul %0, %1, %cst {dimension_numbers = #tpu.dot_dimension_numbers<[1], [0], [0], [1], [0, 0, 1, 1], [], []>} : vector<16x48xbf16>, vector<48x32xbf16>, vector<16x32xf32> -> vector<16x32xf32>
    %c0_3 = arith.constant 0 : index
    %c0_4 = arith.constant 0 : index
    %3 = vector.load %arg3[%c0_3, %c0_4] : memref<16x32xf32, #tpu.memory_space<vmem>>, vector<16x32xf32>
    tpu.vector_store %arg3[%c0_3, %c0_4], %2 {strides = array<i32>} : memref<16x32xf32, #tpu.memory_space<vmem>>, vector<16x32xf32>,
    %c16_i32 = arith.constant 16 : i32
    %4 = arith.muli %arg0, %c16_i32 : i32
    %5 = tpu.iota {dimensions = array<i32: 0>} : vector<16x1xi32>
    %6 = vector.broadcast %4 : i32 to vector<16x1xi32>
    %7 = arith.addi %6, %5 : vector<16x1xi32>
    %c30_i32 = arith.constant 30 : i32
    %8 = vector.broadcast %c30_i32 : i32 to vector<16x1xi32>
    %9 = arith.cmpi slt, %7, %8 : vector<16x1xi32>
    %10 = arith.extui %9 : vector<16x1xi1> to vector<16x1xi32>
    %11 = arith.sitofp %10 : vector<16x1xi32> to vector<16x1xf32>
    %12 = vector.broadcast %11 : vector<16x1xf32> to vector<16x32xf32>
    %13 = arith.mulf %2, %12 : vector<16x32xf32>
    %cst_5 = arith.constant dense<0.000000e+00> : vector<32xf32>
    %14 = vector.multi_reduction <add>, %13, %cst_5 [0] : vector<16x32xf32> to vector<32xf32>
    %15 = vector.shape_cast %14 : vector<32xf32> to vector<1x32xf32>
    %cst_6 = arith.constant dense<0.000000e+00> : vector<1xf32>
    %16 = vector.multi_reduction <add>, %11, %cst_6 [0] : vector<16x1xf32> to vector<1xf32>
    %17 = vector.shape_cast %16 : vector<1xf32> to vector<1x1xf32>
    %18 = vector.broadcast %17 : vector<1x1xf32> to vector<1x32xf32>
    %19 = arith.divf %15, %18 : vector<1x32xf32>
    %20 = vector.broadcast %19 : vector<1x32xf32> to vector<16x32xf32>
    %21 = arith.subf %2, %20 : vector<16x32xf32>
    %22 = vector.broadcast %11 : vector<16x1xf32> to vector<16x32xf32>
    %23 = arith.mulf %21, %22 : vector<16x32xf32>
    %24 = arith.mulf %23, %23 : vector<16x32xf32>
    %cst_7 = arith.constant dense<0.000000e+00> : vector<32xf32>
    %25 = vector.multi_reduction <add>, %24, %cst_7 [0] : vector<16x32xf32> to vector<32xf32>
    %26 = vector.shape_cast %25 : vector<32xf32> to vector<1x32xf32>
    %c0_8 = arith.constant 0 : index
    %c0_9 = arith.constant 0 : index
    %c0_10 = arith.constant 0 : index
    %27 = vector.load %arg4[%c0_8, %c0_9, %c0_10] : memref<1x2x32xf32, #tpu.memory_space<vmem>>, vector<1x1x32xf32>
    %28 = vector.shape_cast %27 : vector<1x1x32xf32> to vector<1x32xf32>
    %29 = vector.shape_cast %15 : vector<1x32xf32> to vector<1x1x32xf32>
    tpu.vector_store %arg4[%c0_8, %c0_9, %c0_10], %29 {strides = array<i32>} : memref<1x2x32xf32, #tpu.memory_space<vmem>>, vector<1x1x32xf32>,
    %c0_11 = arith.constant 0 : index
    %c1 = arith.constant 1 : index
    %c0_12 = arith.constant 0 : index
    %30 = vector.load %arg4[%c0_11, %c1, %c0_12] : memref<1x2x32xf32, #tpu.memory_space<vmem>>, vector<1x1x32xf32>
    %31 = vector.shape_cast %30 : vector<1x1x32xf32> to vector<1x32xf32>
    %32 = vector.shape_cast %26 : vector<1x32xf32> to vector<1x1x32xf32>
    tpu.vector_store %arg4[%c0_11, %c1, %c0_12], %32 {strides = array<i32>} : memref<1x2x32xf32, #tpu.memory_space<vmem>>, vector<1x1x32xf32>,
    return
  }
  func.func @transform_0(%arg0: i32) -> (i32, i32) {
    %c0_i32 = arith.constant 0 : i32
    %c0_i32_0 = arith.constant 0 : i32
    return %arg0, %c0_i32 : i32, i32
  }
  func.func @transform_1(%arg0: i32) -> (i32, i32) {
    %c0_i32 = arith.constant 0 : i32
    %c0_i32_0 = arith.constant 0 : i32
    %c0_i32_1 = arith.constant 0 : i32
    return %c0_i32, %c0_i32_0 : i32, i32
  }
  func.func @transform_2(%arg0: i32) -> (i32, i32) {
    %c0_i32 = arith.constant 0 : i32
    %c0_i32_0 = arith.constant 0 : i32
    return %arg0, %c0_i32 : i32, i32
  }
  func.func @transform_3(%arg0: i32) -> (i32, i32, i32) {
    %c0_i32 = arith.constant 0 : i32
    %c0_i32_0 = arith.constant 0 : i32
    %c0_i32_1 = arith.constant 0 : i32
    return %arg0, %c0_i32, %c0_i32_0 : i32, i32, i32
  }
}

</mosaic_0001>

<bundles_post_ra>
// kernel: tpu_custom_call.1
= control target key start
LH: loop header
LB: loop body
LE: loop exit
PB: predicated region body
PF: predicated region fallthrough
CT: control target
= control target key end

     0   :  { %9 = vsyncpa [#allocation3], 0  ;;  %s818_s0 = inlined_call_operand.vmem [shape: bf16[32,48], index: 0, kind: input, shape index: {}]   ;;  %s819_s1 = inlined_call_operand.vmem [shape: bf16[48,32], index: 1, kind: input, shape index: {}]   ;;  %s820_s2 = inlined_call_operand.hbm [shape: f32[32,32], index: 2, kind: output, shape index: {0}]   ;;  %s821_s3 = inlined_call_operand.hbm [shape: f32[2,2,32], index: 3, kind: output, shape index: {1}]  }
   0x1   :  { %11 = vsyncpa [#allocation3 + $0x1], 0 }
   0x2   :  { %12 = vsyncpa [#allocation5], 0 }
   0x3   :  { %14 = vsyncpa [#allocation5 + $0x1], 0  ;;  %s654_s12 = smov 0   ;;  %s656_s13 = smov 0  }
   0x4   :  { %s658_s14 = smov 0   ;;  %s660_s15 = smov 0  }
   0x5 LB: > { %s675_s16 = sadd.s32 4294967295, %s626_s15   ;;  %s440_s17 = sadd.s32 4294967294, %s626_s15   ;;  %s626_s15 = sphi %s660_s15, %s827_s15   ;;  %s622_s14 = sphi %s658_s14, %s826_s14   ;;  %s618_s13 = sphi %s656_s13, %s825_s13   ;;  %s614_s12 = sphi %s654_s12, %s824_s12  }
   0x6   : > { %s679_s18 = sadd.s32 1, %s626_s15   ;;  %s74_s19 = sadd.s32 1, %s622_s14 }
   0x7   : > { %s71_s20 = ssub.s32 %s626_s15, %s679_s18  ;;  %p84_p0 = scmp.ne.s32.totalorder %s622_s14, %s618_s13 }
   0x8   : > { %p72_p1 = scmp.eq.s32.totalorder %s71_s20, 0  ;;  %p85_p2 = scmp.eq.s32.totalorder %s675_s16, 1 }
   0x9   : > { %p90_p3 = scmp.ne.s32.totalorder %s618_s13, %s614_s12  ;;  %p91_p4 = scmp.eq.s32.totalorder %s440_s17, 1 }
   0xa   : > { %s690_s21 = scalar_select %p72_p1, %s622_s14, %s74_s19  }
   0xb   : > { %p692_p5 = por %p85_p2, %p84_p0  ;;  %p696_p6 = por %p91_p4, %p90_p3 }
   0xc   : > { %p443_p7 = scmp.ge.s32.totalorder %s626_s15, 1  ;;  %p147_p8 = scmp.lt.s32.totalorder %s626_s15, 3 }
   0xe   : > { %p148_p9 = pnand %p443_p7, %p147_p8 }
   0xf   : > { %v526_v0 = vld [vmem:[%s819_s1] sm:$0xff] (!%p148_p9)   ;;  %v628_v1 = vmov (!%p148_p9), 0.0   ;;  %v527_v2 = vld [vmem:[%s819_s1 + $0x8] sm:$0xff] (!%p148_p9)   ;;  %vm629_vm0 = vmmov (!%p148_p9), 0   ;;  %s446_s28 = sshll.u32 (!%p148_p9), %s675_s16, 1  ;;  %v528_v3 = vld [vmem:[%s819_s1 + $0x10] sm:$0xff] (!%p148_p9)   ;;  %v264_v5 = vlaneseq (!%p148_p9) }
  0x10   : > { %151 = sbr.rel (%p148_p9) target bundleno = 307 (0x133), region = 28  ;;  %468 = vmatprep.subr.bf16.mxu0 (!%p148_p9), %v628_v1  ;;  %474 = vmatprep.mubr.msk.bf16.mxu0 (!%p148_p9), %vm629_vm0, %v628_v1  ;;  %p177_p10 = scmp.lt.s32.totalorder (!%p148_p9), %s446_s28, 3  ;;  %vm215_vm1 = vcmask (!%p148_p9), 392192   ;;  %vm260_vm4 = vcmask (!%p148_p9), 261120  }
  0x11   : > { %469 = vmatpush3.bf16.msra.mxu0 (!%p148_p9), %v526_v0  ;;  %v265_v6 = vshrl.u32 (!%p148_p9), %v264_v5, 7  ;;  %s453_s8 = sshll.u32 (!%p148_p9), %s675_s16, 4  ;;  %s723_s9 = sand.u32 (!%p148_p9), 1, %s618_s13  }
  0x12   : > { %470 = vmatprep.subr.bf16.mxu0 (!%p148_p9), %v628_v1  ;;  %v267_v8 = vstv (!%p148_p9), %s453_s8  ;;  %s444_s10 = sshll.u32 (!%p148_p9), %s723_s9, 4  ;;  %s463_s19 = sshll.u32 (!%p148_p9), %s675_s16, 8 }
  0x13   : > { %v266_v7 = vadd.s32 (!%p148_p9), 8, %v265_v6  ;;  %v268_v9 = vadd.s32 (!%p148_p9), %v267_v8, %v265_v6  ;;  %s168_s11 = scalar_lea.vmem (!%p148_p9), [#allocation2], %s444_s10  ;;  %s732_s25 = scalar_lea.hbm (!%p148_p9), %s820_s2, %s463_s19 }
  0x14   : > { %s333_s17 = sshll.u32 (!%p148_p9), %s168_s11, 4  ;;  %s315_s26 = scalar_lea.sflag (!%p148_p9), [#allocation3], %s723_s9  ;;  %s727_s17 = int_to_ptr.vmem [resolvable:$true] %s333_s17 }
  0x15   : > { %471 = vmatpush3.bf16.msra.mxu0 (!%p148_p9), %v527_v2  ;;  %v269_v10 = vadd.s32 (!%p148_p9), %v267_v8, %v266_v7  ;;  %vm270_vm2 = vcmp.lt.s32.totalorder (!%p148_p9), %v268_v9, 30  ;;  %s532_s27 = scalar_lea.vmem (!%p148_p9), %s727_s17, 256 }
  0x16   : > { %472 = vmatprep.subr.bf16.mxu0 (!%p148_p9), %v628_v1  ;;  %v716_v11 = vsel (!%p148_p9), %vm270_vm2, 1.0, %v628_v1  ;;  %p533_p11 = scmp.ne.s32.totalorder (!%p148_p9), %s727_s17, %s532_s27 }
  0x17   : > { %s829_s28 = smov (!%p177_p10, %s446_s28), 3  ;;  %vm271_vm3 = vcmp.lt.s32.totalorder %v269_v10, 30 }
  0x18   : > { %s447_s4 = sshll.u32 %s829_s28, 2  ;;  %v718_v12 = vsel %vm271_vm3, 1.0, %v628_v1  ;;  %p534_p12 = pnand %p533_p11, %p692_p5 }
  0x19   : > { %s180_s7 = scalar_lea.vmem %s818_s0, %s447_s4  ;;  %473 = vmatpush3.bf16.msra.mxu0 %v528_v3  ;;  %v287_v13 = vadd.f32 %v718_v12, %v716_v11  ;;  %s630_s28 = smov [#allocation2]  }
  0x1a   : > { %v529_v4 = vld [vmem:[%s180_s7] sm:$0xff]   ;;  %p535_p13 = pneg %p534_p12  ;;  %s536_s29 = sshll.u32 %s630_s28, 4  ;;  %s537_s29 = int_to_ptr.vmem [resolvable:$false] %s536_s29 }
  0x1b   : > { %v288_v14 = vrot.slane %v287_v13, 4  ;;  %s538_s30 = scalar_lea.vmem %s537_s29, 512  ;;  %p539_p0 = scmp.lt.s32.totalorder %s727_s17, %s537_s29 }
  0x1c   : > { %475 = vmatmul.mubr.msk.bf16.vlgmr.msra.gmra.mrb[0].mxu0 %vm215_vm1, %v529_v4  ;;  %p540_p1 = scmp.lt.s32.totalorder %s538_s30, %s532_s27 }
  0x1d   : > { %v289_v15 = vadd.f32 %v288_v14, %v287_v13 }
  0x1e   : > { %p541_p2 = por %p540_p1, %p539_p0 }
  0x1f   : > { %v290_v16 = vrot.slane %v289_v15, 2 }
  0x20   : > { %p542_p3 = pnand %p541_p2, %p535_p13 }
  0x21   : > { %v291_v17 = vadd.f32 %v290_v16, %v289_v15 }
  0x23   : > { %v292_v18 = vrot.slane %v291_v17, 1 }
  0x25   : > { %v293_v24 = vadd.f32 %v292_v18, %v291_v17 }
  0xef   : > { %v253_v19 = vpop.f32.mrb[0].mxu0 }
  0xf0   : > { %261 = vst.msk [vmem:[%s168_s11] sm:$0xff] %vm260_vm4, %v253_v19  ;;  %v276_v20 = vmul.f32 %v716_v11, %v253_v19  ;;  %v476_v21 = vpop.f32.mrb[1].mxu0 }
  0xf1   : > { %v256_v22 = vpop.f32.mrb[2].mxu0 }
  0xf2   : > { %262 = vst.msk [vmem:[%s168_s11 + $0x8] sm:$0xff] %vm260_vm4, %v256_v22  ;;  %v277_v23 = vmul.f32 %v718_v12, %v256_v22  ;;  %v477_v25 = vpop.f32.mrb[3].mxu0 }
  0xf3   : > { %545 = shalt.err (!%p542_p3)
}
  0xf4   : > { %s546_s4 = scalar_lea.hbm %s732_s25, 256  ;;  %s550_s7 = scalar_lea.hbm %s820_s2, 512 }
  0xf5   : > { %p547_p4 = scmp.ne.s32.totalorder %s732_s25, %s546_s4  ;;  %p551_p9 = scmp.lt.u32.totalorder %s732_s25, %s820_s2 }
  0xf6   : > { %p552_p10 = scmp.lt.u32.totalorder %s550_s7, %s546_s4  ;;  %p554_p12 = scmp.lt.u32.totalorder %s546_s4, %s732_s25 }
  0xf7   : > { %p548_p7 = pnand %p547_p4, %p692_p5 }
  0xf8   : > { %p553_p11 = por %p552_p10, %p551_p9 }
  0xf9   : > { %p549_p8 = pneg %p548_p7 }
  0xfa   : > { %p555_p13 = por %p554_p12, %p553_p11 }
  0xfc   : > { %p556_p0 = pnand %p555_p13, %p549_p8 }
  0xfe   : > { %559 = shalt.err (!%p556_p0)
}
  0xff   : > { %s631_s11 = smov 128   ;;  %s632_s19 = smov 8   ;;  %v278_v26 = vsel %vm260_vm4, %v276_v20, 0.0  ;;  %v279_v27 = vsel %vm260_vm4, %v277_v23, 0.0  ;;  %530 = vrcp.f32 %v293_v24  ;;  %vm311_vm5 = vcmask 253952  }
 0x100   : > { %478 = dma.vmem_to_hbm [thread:$0]  (%p692_p5), %s727_s17, 256, %s732_s25, %s315_s26, %s631_s11, %s631_s11, %s632_s19   ;;  %v280_v28 = vadd.f32 %v279_v27, %v278_v26 }
 0x101   : > { %s445_s20 = sshll.u32 %s723_s9, 1  ;;  %s460_s17 = sshll.u32 %s675_s16, 5 }
 0x102   : > { %v281_v29 = vrot.slane %v280_v28, 4  ;;  %s175_s24 = scalar_lea.vmem [#allocation4], %s445_s20  ;;  %s774_s28 = scalar_lea.hbm %s821_s3, %s460_s17 }
 0x103   : > { %s349_s25 = sshll.u32 %s175_s24, 4  ;;  %s320_s29 = scalar_lea.sflag [#allocation5], %s723_s9  ;;  %s776_s25 = int_to_ptr.vmem [resolvable:$true] %s349_s25 }
 0x104   : > { %v282_v30 = vadd.f32 %v281_v29, %v280_v28  ;;  %s560_s30 = scalar_lea.vmem %s776_s25, 32  ;;  %s633_s16 = smov [#allocation4]  }
 0x105   : > { %p561_p1 = scmp.ne.s32.totalorder %s776_s25, %s560_s30  ;;  %s564_s4 = sshll.u32 %s633_s16, 4  ;;  %s565_s4 = int_to_ptr.vmem [resolvable:$false] %s564_s4 }
 0x106   : > { %v283_v31 = vrot.slane %v282_v30, 2  ;;  %s566_s5 = scalar_lea.vmem %s565_s4, 64  ;;  %p567_p4 = scmp.lt.s32.totalorder %s776_s25, %s565_s4 }
 0x107   : > { %p562_p2 = pnand %p561_p1, %p692_p5  ;;  %p568_p7 = scmp.lt.s32.totalorder %s566_s5, %s560_s30 }
 0x108   : > { %v284_v32 = vadd.f32 %v283_v31, %v282_v30 }
 0x109   : > { %v531_v34 = vpop.eup %530  ;;  %p563_p3 = pneg %p562_p2  ;;  %p569_p8 = por %p568_p7, %p567_p4 }
 0x10a   : > { %v285_v33 = vrot.slane %v284_v32, 1 }
 0x10b   : > { %p570_p9 = pnand %p569_p8, %p563_p3 }
 0x10c   : > { %v286_v35 = vadd.f32 %v285_v33, %v284_v32 }
 0x10e   : > { %v295_v36 = vmul.f32 %v531_v34, %v286_v35  ;;  %312 = vst.msk [vmem:[%s175_s24] sm:$0x1] %vm311_vm5, %v286_v35 }
 0x110   : > { %v296_v37 = vsub.f32 %v253_v19, %v295_v36  ;;  %v297_v38 = vsub.f32 %v256_v22, %v295_v36 }
 0x112   : > { %v298_v39 = vmul.f32 %v716_v11, %v296_v37  ;;  %v299_v40 = vmul.f32 %v718_v12, %v297_v38 }
 0x114   : > { %v300_v41 = vmul.f32 %v298_v39, %v298_v39  ;;  %v301_v42 = vmul.f32 %v299_v40, %v299_v40 }
 0x116   : > { %v302_v43 = vsel %vm260_vm4, %v300_v41, 0.0  ;;  %v303_v44 = vsel %vm260_vm4, %v301_v42, 0.0 }
 0x117   : > { %v304_v45 = vadd.f32 %v303_v44, %v302_v43 }
 0x119   : > { %v305_v46 = vrot.slane %v304_v45, 4 }
 0x11b   : > { %v306_v47 = vadd.f32 %v305_v46, %v304_v45 }
 0x11d   : > { %v307_v48 = vrot.slane %v306_v47, 2 }
 0x11f   : > { %v308_v49 = vadd.f32 %v307_v48, %v306_v47 }
 0x121   : > { %v309_v50 = vrot.slane %v308_v49, 1 }
 0x123   : > { %v310_v51 = vadd.f32 %v309_v50, %v308_v49 }
 0x125   : > { %313 = vst.msk [vmem:[%s175_s24 + $0x1] sm:$0x1] %vm311_vm5, %v310_v51 }
 0x126   : > { %573 = shalt.err (!%p570_p9)
}
 0x127   : > { %s574_s9 = scalar_lea.hbm %s774_s28, 32  ;;  %s578_s8 = scalar_lea.hbm %s821_s3, 64 }
 0x128   : > { %p575_p10 = scmp.ne.s32.totalorder %s774_s28, %s574_s9  ;;  %p579_p13 = scmp.lt.u32.totalorder %s774_s28, %s821_s3 }
 0x129   : > { %p580_p0 = scmp.lt.u32.totalorder %s578_s8, %s574_s9  ;;  %p582_p2 = scmp.lt.u32.totalorder %s574_s9, %s774_s28 }
 0x12a   : > { %p576_p11 = pnand %p575_p10, %p692_p5 }
 0x12b   : > { %p581_p1 = por %p580_p0, %p579_p13 }
 0x12c   : > { %p577_p12 = pneg %p576_p11 }
 0x12d   : > { %p583_p3 = por %p582_p2, %p581_p1 }
 0x12f   : > { %p584_p4 = pnand %p583_p3, %p577_p12 }
 0x131   : > { %587 = shalt.err (!%p584_p4)
}
 0x132   : > { %479 = dma.vmem_to_hbm [thread:$0]  (%p692_p5), %s776_s25, 32, %s774_s28, %s320_s29  }
 0x133 PF: > { %p489_p7 = scmp.ge.s32.totalorder %s626_s15, 2  ;;  %s361_s19 = sand.u32 1, %s614_s12  }
 0x134   : > { %s362_s20 = scalar_lea.sflag [#allocation3], %s361_s19 }
 0x135   : > { %p483_p8 = pnand %p489_p7, %p696_p6 }
 0x137   : > { %605 = dma.done.wait (!%p483_p8), %s362_s20, 256  }
 0x138   : > { %607 = vsyncadd (!%p483_p8), %s362_s20, 4294967040  ;;  %s371_s24 = scalar_lea.sflag [#allocation5], %s361_s19 }
 0x139   : > { %609 = dma.done.wait (!%p483_p8), %s371_s24, 32  }
 0x13a   : > { %611 = vsyncadd (!%p483_p8), %s371_s24, 4294967264  ;;  %p17_p5 = scmp.ge.s32.totalorder %s679_s18, 4   ;;  %s824_s12 = smov %s618_s13 }
 0x13b   : > { %s825_s13 = smov %s622_s14  ;;  %s826_s14 = smov %s690_s21 }
 0x13c   : > { %s827_s15 = smov %s679_s18  ;;  %19 = sbr.rel (!%p17_p5) target bundleno = 5 (0x5), region = 80 }
 0x143   :  { %376 = vsyncpa [#allocation3], 1 }
 0x144   :  { %378 = vsyncpa [#allocation3 + $0x1], 1 }
 0x145   :  { %379 = vsyncpa [#allocation5], 1 }
 0x146   :  { %381 = vsyncpa [#allocation5 + $0x1], 1 }

</bundles_post_ra>
